<compile_context>
chip_gen: v7x
topology: tpu7x:2x2x1
jax: 0.10.0
libtpu: 0.0.40
codegen_flags: <defaults>
</compile_context>

<pallas_src>
import jax
import jax.numpy as jnp
from jax.experimental import pallas as pl
from jax.experimental.pallas import tpu as pltpu


def _complex_linear_kernel(xr_ref, xi_ref, wre_ref, wim_ref, bre_ref, bim_ref,
                           out_re_ref, out_im_ref, acc_re, acc_im):
    k = pl.program_id(2)

    @pl.when(k == 0)
    def _():
        acc_re[...] = jnp.zeros_like(acc_re)
        acc_im[...] = jnp.zeros_like(acc_im)

    xr = xr_ref[...]
    xi = xi_ref[...]
    wre = wre_ref[...]
    wim = wim_ref[...]

    # Complex matmul: share the weight tiles between both accumulators.
    acc_re[...] += (jnp.dot(xr, wre, preferred_element_type=jnp.float32)
                    - jnp.dot(xi, wim, preferred_element_type=jnp.float32))
    acc_im[...] += (jnp.dot(xi, wre, preferred_element_type=jnp.float32)
                    + jnp.dot(xr, wim, preferred_element_type=jnp.float32))

    @pl.when(k == pl.num_programs(2) - 1)
    def _():
        out_re_ref[...] = (acc_re[...] + bre_ref[...]).astype(out_re_ref.dtype)
        out_im_ref[...] = (acc_im[...] + bim_ref[...]).astype(out_im_ref.dtype)


def _pick_tile(dim, preferred):
    """Largest preferred tile that divides dim, else full extent (always legal)."""
    for t in preferred:
        if dim % t == 0:
            return t
    return dim


def complex_linear(x, w_re, w_im, b_re=None, b_im=None, *,
                   tm=None, tn=None, tk=None):
    """Pallas implementation of ComplexLinear.forward."""
    assert x.ndim == 3 and x.shape[1] == 2, "expected x of shape [B, 2, in_features]"
    B, _, K = x.shape
    assert w_re.shape == w_im.shape and w_re.shape[0] == K
    N = w_re.shape[1]
    out_dtype = x.dtype

    if b_re is None:
        b_re = jnp.zeros((N,), dtype=jnp.float32)
    if b_im is None:
        b_im = jnp.zeros((N,), dtype=jnp.float32)

    # Fold the bias arithmetic of the complex combination once (N-length ops):
    #   real = xr@Wre - xi@Wim + (b_re - b_im)
    #   imag = xi@Wre + xr@Wim + (b_re + b_im)
    bias_re = (b_re.astype(jnp.float32) - b_im.astype(jnp.float32)).reshape(1, N)
    bias_im = (b_re.astype(jnp.float32) + b_im.astype(jnp.float32)).reshape(1, N)

    # One extra HBM pass over x; negligible vs. matmul traffic and keeps every
    # kernel operand lane-dense with full-sublane tiles (a size-1 block on the
    # second-to-last axis of [B, 2, K] would violate the (8,128) block rule).
    x_r = x[:, 0, :]
    x_i = x[:, 1, :]

    # Tile sizes: big enough to amortize the ~0.35us/step overhead, small
    # enough that 2in(x) + 2in(w) + 2out double-buffered + 2 f32 accumulators
    # fit v5e's 16 MiB default scoped VMEM (and v7x's 64 MiB physical VMEM).
    tm = tm or _pick_tile(B, (256, 128, 64, 32, 16, 8))
    tk = tk or _pick_tile(K, (512, 256, 128))
    tn = tn or _pick_tile(N, (512, 256, 128))

    grid = (B // tm, N // tn, K // tk)

    grid_spec = pltpu.PrefetchScalarGridSpec(
        num_scalar_prefetch=0,
        grid=grid,
        in_specs=[
            pl.BlockSpec((tm, tk), lambda i, j, k: (i, k)),   # x real
            pl.BlockSpec((tm, tk), lambda i, j, k: (i, k)),   # x imag
            pl.BlockSpec((tk, tn), lambda i, j, k: (k, j)),   # W_re
            pl.BlockSpec((tk, tn), lambda i, j, k: (k, j)),   # W_im
            pl.BlockSpec((1, tn), lambda i, j, k: (0, j)),    # bias for real out
            pl.BlockSpec((1, tn), lambda i, j, k: (0, j)),    # bias for imag out
        ],
        out_specs=[
            pl.BlockSpec((tm, tn), lambda i, j, k: (i, j)),
            pl.BlockSpec((tm, tn), lambda i, j, k: (i, j)),
        ],
        scratch_shapes=[pltpu.VMEM((tm, tn), jnp.float32),
                        pltpu.VMEM((tm, tn), jnp.float32)],
    )

    out_re, out_im = pl.pallas_call(
        _complex_linear_kernel,
        grid_spec=grid_spec,
        out_shape=(jax.ShapeDtypeStruct((B, N), out_dtype),
                   jax.ShapeDtypeStruct((B, N), out_dtype)),
        compiler_params=pltpu.CompilerParams(
            dimension_semantics=("parallel", "parallel", "arbitrary")),
    )(x_r, x_i, w_re, w_im, bias_re, bias_im)

    # Cheap relative to the matmul: interleave real/imag back to [B, 2, N].
    return jnp.stack((out_re, out_im), axis=1)


def _reference(x, w_re, w_im, b_re, b_im):
    hp = jax.lax.Precision.HIGHEST
    xr = x[:, 0].astype(jnp.float32)
    xi = x[:, 1].astype(jnp.float32)
    wre = w_re.astype(jnp.float32)
    wim = w_im.astype(jnp.float32)
    br = 0.0 if b_re is None else b_re.astype(jnp.float32)
    bi = 0.0 if b_im is None else b_im.astype(jnp.float32)
    lin_re = lambda z: jnp.dot(z, wre, precision=hp) + br
    lin_im = lambda z: jnp.dot(z, wim, precision=hp) + bi
    real = lin_re(xr) - lin_im(xi)
    imag = lin_re(xi) + lin_im(xr)
    return jnp.stack((real, imag), axis=1).astype(x.dtype)


if __name__ == "__main__":
    key = jax.random.PRNGKey(0)
    ok = True

    # (B, in_features, out_features, use_bias)
    cases = [
        (4, 32, 64, True),      # tiny: full-extent blocks, grid (1, 1, 1)
        (16, 384, 384, True),   # tiled: grid (1, 3, 3), exercises K reduction
        (16, 384, 384, False),  # no-bias path
    ]
    for (B, K, N, use_bias) in cases:
        k0, k1, k2, k3, k4, key = jax.random.split(key, 6)
        x = jax.random.normal(k0, (B, 2, K), dtype=jnp.float32)
        w_re = jax.random.normal(k1, (K, N), dtype=jnp.float32) / jnp.sqrt(K)
        w_im = jax.random.normal(k2, (K, N), dtype=jnp.float32) / jnp.sqrt(K)
        b_re = jax.random.normal(k3, (N,), dtype=jnp.float32) if use_bias else None
        b_im = jax.random.normal(k4, (N,), dtype=jnp.float32) if use_bias else None

        out = complex_linear(x, w_re, w_im, b_re, b_im)
        jax.block_until_ready(out)
        ref = _reference(x, w_re, w_im, b_re, b_im)
        if out.shape != (B, 2, N) or not jnp.allclose(out, ref, atol=1e-3, rtol=1e-3):
            ok = False
            err = jnp.max(jnp.abs(out - ref))
            print(f"MISMATCH B={B} K={K} N={N} bias={use_bias} max_err={err}")

    if ok:
        print("KERNEL_OK")
</pallas_src>

<mosaic_0001>
module attributes {stable_mosaic.version = 11 : i64} {
  func.func @_complex_linear_kernel(%arg0: i32, %arg1: i32, %arg2: i32, %arg3: memref<4x32xf32, #tpu.memory_space<vmem>>, %arg4: memref<4x32xf32, #tpu.memory_space<vmem>>, %arg5: memref<32x64xf32, #tpu.memory_space<vmem>>, %arg6: memref<32x64xf32, #tpu.memory_space<vmem>>, %arg7: memref<1x64xf32, #tpu.memory_space<vmem>>, %arg8: memref<1x64xf32, #tpu.memory_space<vmem>>, %arg9: memref<4x64xf32, #tpu.memory_space<vmem>>, %arg10: memref<4x64xf32, #tpu.memory_space<vmem>>, %arg11: memref<4x64xf32, #tpu.memory_space<vmem>>, %arg12: memref<4x64xf32, #tpu.memory_space<vmem>>) attributes {dimension_semantics = [#tpu.dimension_semantics<parallel>, #tpu.dimension_semantics<parallel>, #tpu.dimension_semantics<arbitrary>], iteration_bounds = array<i64: 1, 1, 1>, scalar_prefetch = 0 : i64, scratch_operands = 2 : i64, tpu.core_type = #tpu.core_type<tc>, window_params = [{transform_indices = @transform_0, window_bounds = array<i64: 4, 32>}, {transform_indices = @transform_1, window_bounds = array<i64: 4, 32>}, {transform_indices = @transform_2, window_bounds = array<i64: 32, 64>}, {transform_indices = @transform_3, window_bounds = array<i64: 32, 64>}, {transform_indices = @transform_4, window_bounds = array<i64: 1, 64>}, {transform_indices = @transform_5, window_bounds = array<i64: 1, 64>}, {transform_indices = @transform_6, window_bounds = array<i64: 4, 64>}, {transform_indices = @transform_7, window_bounds = array<i64: 4, 64>}]} {
    %c0_i32 = arith.constant 0 : i32
    %0 = arith.cmpi eq, %arg2, %c0_i32 : i32
    %1 = arith.extui %0 : i1 to i32
    %c0_i32_0 = arith.constant 0 : i32
    %2 = arith.cmpi ne, %1, %c0_i32_0 : i32
    scf.if %2 {
      %cst_21 = arith.constant 0.000000e+00 : f32
      %22 = vector.broadcast %cst_21 : f32 to vector<4x64xf32>
      %c0_22 = arith.constant 0 : index
      %c0_23 = arith.constant 0 : index
      %23 = vector.load %arg11[%c0_22, %c0_23] : memref<4x64xf32, #tpu.memory_space<vmem>>, vector<4x64xf32>
      tpu.vector_store %arg11[%c0_22, %c0_23], %22 {strides = array<i32>} : memref<4x64xf32, #tpu.memory_space<vmem>>, vector<4x64xf32>,
      %cst_24 = arith.constant 0.000000e+00 : f32
      %24 = vector.broadcast %cst_24 : f32 to vector<4x64xf32>
      %c0_25 = arith.constant 0 : index
      %c0_26 = arith.constant 0 : index
      %25 = vector.load %arg12[%c0_25, %c0_26] : memref<4x64xf32, #tpu.memory_space<vmem>>, vector<4x64xf32>
      tpu.vector_store %arg12[%c0_25, %c0_26], %24 {strides = array<i32>} : memref<4x64xf32, #tpu.memory_space<vmem>>, vector<4x64xf32>,
    } else {
    }
    %c0 = arith.constant 0 : index
    %c0_1 = arith.constant 0 : index
    %3 = vector.load %arg3[%c0, %c0_1] : memref<4x32xf32, #tpu.memory_space<vmem>>, vector<4x32xf32>
    %c0_2 = arith.constant 0 : index
    %c0_3 = arith.constant 0 : index
    %4 = vector.load %arg4[%c0_2, %c0_3] : memref<4x32xf32, #tpu.memory_space<vmem>>, vector<4x32xf32>
    %c0_4 = arith.constant 0 : index
    %c0_5 = arith.constant 0 : index
    %5 = vector.load %arg5[%c0_4, %c0_5] : memref<32x64xf32, #tpu.memory_space<vmem>>, vector<32x64xf32>
    %c0_6 = arith.constant 0 : index
    %c0_7 = arith.constant 0 : index
    %6 = vector.load %arg6[%c0_6, %c0_7] : memref<32x64xf32, #tpu.memory_space<vmem>>, vector<32x64xf32>
    %c0_8 = arith.constant 0 : index
    %c0_9 = arith.constant 0 : index
    %7 = vector.load %arg11[%c0_8, %c0_9] : memref<4x64xf32, #tpu.memory_space<vmem>>, vector<4x64xf32>
    %cst = arith.constant dense<0.000000e+00> : vector<4x64xf32>
    %8 = tpu.matmul %3, %5, %cst {dimension_numbers = #tpu.dot_dimension_numbers<[1], [0], [0], [1], [0, 0, 1, 1], [], []>} : vector<4x32xf32>, vector<32x64xf32>, vector<4x64xf32> -> vector<4x64xf32>
    %cst_10 = arith.constant dense<0.000000e+00> : vector<4x64xf32>
    %9 = tpu.matmul %4, %6, %cst_10 {dimension_numbers = #tpu.dot_dimension_numbers<[1], [0], [0], [1], [0, 0, 1, 1], [], []>} : vector<4x32xf32>, vector<32x64xf32>, vector<4x64xf32> -> vector<4x64xf32>
    %10 = arith.subf %8, %9 : vector<4x64xf32>
    %11 = arith.addf %7, %10 : vector<4x64xf32>
    %c0_11 = arith.constant 0 : index
    %c0_12 = arith.constant 0 : index
    %12 = vector.load %arg11[%c0_11, %c0_12] : memref<4x64xf32, #tpu.memory_space<vmem>>, vector<4x64xf32>
    tpu.vector_store %arg11[%c0_11, %c0_12], %11 {strides = array<i32>} : memref<4x64xf32, #tpu.memory_space<vmem>>, vector<4x64xf32>,
    %c0_13 = arith.constant 0 : index
    %c0_14 = arith.constant 0 : index
    %13 = vector.load %arg12[%c0_13, %c0_14] : memref<4x64xf32, #tpu.memory_space<vmem>>, vector<4x64xf32>
    %cst_15 = arith.constant dense<0.000000e+00> : vector<4x64xf32>
    %14 = tpu.matmul %4, %5, %cst_15 {dimension_numbers = #tpu.dot_dimension_numbers<[1], [0], [0], [1], [0, 0, 1, 1], [], []>} : vector<4x32xf32>, vector<32x64xf32>, vector<4x64xf32> -> vector<4x64xf32>
    %cst_16 = arith.constant dense<0.000000e+00> : vector<4x64xf32>
    %15 = tpu.matmul %3, %6, %cst_16 {dimension_numbers = #tpu.dot_dimension_numbers<[1], [0], [0], [1], [0, 0, 1, 1], [], []>} : vector<4x32xf32>, vector<32x64xf32>, vector<4x64xf32> -> vector<4x64xf32>
    %16 = arith.addf %14, %15 : vector<4x64xf32>
    %17 = arith.addf %13, %16 : vector<4x64xf32>
    %c0_17 = arith.constant 0 : index
    %c0_18 = arith.constant 0 : index
    %18 = vector.load %arg12[%c0_17, %c0_18] : memref<4x64xf32, #tpu.memory_space<vmem>>, vector<4x64xf32>
    tpu.vector_store %arg12[%c0_17, %c0_18], %17 {strides = array<i32>} : memref<4x64xf32, #tpu.memory_space<vmem>>, vector<4x64xf32>,
    %c0_i32_19 = arith.constant 0 : i32
    %19 = arith.cmpi eq, %arg2, %c0_i32_19 : i32
    %20 = arith.extui %19 : i1 to i32
    %c0_i32_20 = arith.constant 0 : i32
    %21 = arith.cmpi ne, %20, %c0_i32_20 : i32
    scf.if %21 {
      %c0_21 = arith.constant 0 : index
      %c0_22 = arith.constant 0 : index
      %22 = vector.load %arg11[%c0_21, %c0_22] : memref<4x64xf32, #tpu.memory_space<vmem>>, vector<4x64xf32>
      %c0_23 = arith.constant 0 : index
      %c0_24 = arith.constant 0 : index
      %23 = vector.load %arg7[%c0_23, %c0_24] : memref<1x64xf32, #tpu.memory_space<vmem>>, vector<1x64xf32>
      %24 = vector.broadcast %23 : vector<1x64xf32> to vector<4x64xf32>
      %25 = arith.addf %22, %24 : vector<4x64xf32>
      %c0_25 = arith.constant 0 : index
      %c0_26 = arith.constant 0 : index
      %26 = vector.load %arg9[%c0_25, %c0_26] : memref<4x64xf32, #tpu.memory_space<vmem>>, vector<4x64xf32>
      tpu.vector_store %arg9[%c0_25, %c0_26], %25 {strides = array<i32>} : memref<4x64xf32, #tpu.memory_space<vmem>>, vector<4x64xf32>,
      %c0_27 = arith.constant 0 : index
      %c0_28 = arith.constant 0 : index
      %27 = vector.load %arg12[%c0_27, %c0_28] : memref<4x64xf32, #tpu.memory_space<vmem>>, vector<4x64xf32>
      %c0_29 = arith.constant 0 : index
      %c0_30 = arith.constant 0 : index
      %28 = vector.load %arg8[%c0_29, %c0_30] : memref<1x64xf32, #tpu.memory_space<vmem>>, vector<1x64xf32>
      %29 = vector.broadcast %28 : vector<1x64xf32> to vector<4x64xf32>
      %30 = arith.addf %27, %29 : vector<4x64xf32>
      %c0_31 = arith.constant 0 : index
      %c0_32 = arith.constant 0 : index
      %31 = vector.load %arg10[%c0_31, %c0_32] : memref<4x64xf32, #tpu.memory_space<vmem>>, vector<4x64xf32>
      tpu.vector_store %arg10[%c0_31, %c0_32], %30 {strides = array<i32>} : memref<4x64xf32, #tpu.memory_space<vmem>>, vector<4x64xf32>,
    } else {
    }
    return
  }
  func.func @transform_0(%arg0: i32, %arg1: i32, %arg2: i32) -> (i32, i32) {
    %c0_i32 = arith.constant 0 : i32
    return %arg0, %arg2 : i32, i32
  }
  func.func @transform_1(%arg0: i32, %arg1: i32, %arg2: i32) -> (i32, i32) {
    %c0_i32 = arith.constant 0 : i32
    return %arg0, %arg2 : i32, i32
  }
  func.func @transform_2(%arg0: i32, %arg1: i32, %arg2: i32) -> (i32, i32) {
    %c0_i32 = arith.constant 0 : i32
    return %arg2, %arg1 : i32, i32
  }
  func.func @transform_3(%arg0: i32, %arg1: i32, %arg2: i32) -> (i32, i32) {
    %c0_i32 = arith.constant 0 : i32
    return %arg2, %arg1 : i32, i32
  }
  func.func @transform_4(%arg0: i32, %arg1: i32, %arg2: i32) -> (i32, i32) {
    %c0_i32 = arith.constant 0 : i32
    %c0_i32_0 = arith.constant 0 : i32
    return %c0_i32, %arg1 : i32, i32
  }
  func.func @transform_5(%arg0: i32, %arg1: i32, %arg2: i32) -> (i32, i32) {
    %c0_i32 = arith.constant 0 : i32
    %c0_i32_0 = arith.constant 0 : i32
    return %c0_i32, %arg1 : i32, i32
  }
  func.func @transform_6(%arg0: i32, %arg1: i32, %arg2: i32) -> (i32, i32) {
    %c0_i32 = arith.constant 0 : i32
    return %arg0, %arg1 : i32, i32
  }
  func.func @transform_7(%arg0: i32, %arg1: i32, %arg2: i32) -> (i32, i32) {
    %c0_i32 = arith.constant 0 : i32
    return %arg0, %arg1 : i32, i32
  }
}

</mosaic_0001>

<bundles_post_ra>
// kernel: tpu_custom_call.1
= control target key start
LH: loop header
LB: loop body
LE: loop exit
PB: predicated region body
PF: predicated region fallthrough
CT: control target
= control target key end

     0   :  { %13 = vsyncpa [#allocation5], 0  ;;  %s834_s0 = inlined_call_operand.hbm [shape: f32[4,32], index: 0, kind: input, shape index: {}]   ;;  %s835_s1 = inlined_call_operand.hbm [shape: f32[4,32], index: 1, kind: input, shape index: {}]   ;;  %s836_s2 = inlined_call_operand.hbm [shape: f32[32,64], index: 2, kind: input, shape index: {}]   ;;  %s837_s3 = inlined_call_operand.hbm [shape: f32[32,64], index: 3, kind: input, shape index: {}]   ;;  %s838_s4 = inlined_call_operand.vmem [shape: f32[1,64], index: 4, kind: input, shape index: {}]   ;;  %s839_s5 = inlined_call_operand.vmem [shape: f32[1,64], index: 5, kind: input, shape index: {}]   ;;  %s840_s6 = inlined_call_operand.hbm [shape: f32[4,64], index: 6, kind: output, shape index: {0}]   ;;  %s841_s7 = inlined_call_operand.hbm [shape: f32[4,64], index: 7, kind: output, shape index: {1}]  }
   0x1   :  { %14 = vsyncpa [#allocation8], 0 }
   0x2   :  { %15 = vsyncpa [#allocation11], 0 }
   0x3   :  { %16 = vsyncpa [#allocation6], 0 }
   0x4   :  { %17 = vsyncpa [#allocation14], 0  ;;  %s691_s24 = smov [#allocation7]   ;;  %s692_s26 = smov [#allocation4]  }
   0x5   :  { %s34_s25 = sshll.u32 %s691_s24, 4  ;;  %s24_s27 = sshll.u32 %s692_s26, 4  ;;  %s35_s25 = int_to_ptr.vmem [resolvable:$true] %s34_s25  ;;  %s25_s27 = int_to_ptr.vmem [resolvable:$true] %s24_s27 }
   0x6   :  { %s549_s30 = scalar_lea.hbm %s835_s1, 64 }
   0x7   :  { %p550_p0 = scmp.ne.s32.totalorder %s835_s1, %s549_s30  ;;  %p553_p1 = scmp.lt.u32.totalorder %s549_s30, %s835_s1 }
   0x9   :  { %p555_p2 = pnand %p553_p1, %p550_p0 }
   0xb   :  { %558 = shalt.err (!%p555_p2)
}
   0xc   :  { %s559_s12 = scalar_lea.vmem %s35_s25, 64  ;;  %p564_p4 = scmp.lt.s32.totalorder %s35_s25, %s35_s25 }
   0xd   :  { %p560_p3 = scmp.ne.s32.totalorder %s35_s25, %s559_s12  ;;  %p565_p5 = scmp.lt.s32.totalorder %s559_s12, %s559_s12 }
   0xf   :  { %p566_p6 = por %p565_p5, %p564_p4 }
  0x11   :  { %p567_p7 = pnand %p566_p6, %p560_p3 }
  0x13   :  { %570 = shalt.err (!%p567_p7)
}
  0x14   :  { %37 = dma.hbm_to_vmem [thread:$0]  %s835_s1, 64, %s35_s25, [#allocation8]  }
  0x15   :  { %s571_s17 = scalar_lea.hbm %s834_s0, 64 }
  0x16   :  { %p572_p8 = scmp.ne.s32.totalorder %s834_s0, %s571_s17  ;;  %p575_p9 = scmp.lt.u32.totalorder %s571_s17, %s834_s0 }
  0x18   :  { %p577_p10 = pnand %p575_p9, %p572_p8 }
  0x1a   :  { %580 = shalt.err (!%p577_p10)
}
  0x1b   :  { %s581_s22 = scalar_lea.vmem %s25_s27, 64  ;;  %p586_p12 = scmp.lt.s32.totalorder %s25_s27, %s25_s27 }
  0x1c   :  { %p582_p11 = scmp.ne.s32.totalorder %s25_s27, %s581_s22  ;;  %p587_p13 = scmp.lt.s32.totalorder %s581_s22, %s581_s22 }
  0x1e   :  { %p588_p0 = por %p587_p13, %p586_p12 }
  0x20   :  { %p589_p1 = pnand %p588_p0, %p582_p11 }
  0x22   :  { %592 = shalt.err (!%p589_p1)
}
  0x23   :  { %27 = dma.hbm_to_vmem [thread:$0]  %s834_s0, 64, %s25_s27, [#allocation5]  }
  0x24   :  { %s693_s24 = smov [#allocation9]   ;;  %s593_s29 = scalar_lea.hbm %s836_s2, 512 }
  0x25   :  { %s43_s25 = sshll.u32 %s693_s24, 4  ;;  %p594_p2 = scmp.ne.s32.totalorder %s836_s2, %s593_s29  ;;  %s44_s25 = int_to_ptr.vmem [resolvable:$true] %s43_s25 }
  0x26   :  { %p597_p3 = scmp.lt.u32.totalorder %s593_s29, %s836_s2 }
  0x28   :  { %p599_p4 = pnand %p597_p3, %p594_p2 }
  0x2a   :  { %602 = shalt.err (!%p599_p4)
}
  0x2b   :  { %s603_s11 = scalar_lea.vmem %s44_s25, 512  ;;  %p608_p6 = scmp.lt.s32.totalorder %s44_s25, %s44_s25 }
  0x2c   :  { %p604_p5 = scmp.ne.s32.totalorder %s44_s25, %s603_s11  ;;  %p609_p7 = scmp.lt.s32.totalorder %s603_s11, %s603_s11 }
  0x2e   :  { %p610_p8 = por %p609_p7, %p608_p6 }
  0x30   :  { %p611_p9 = pnand %p610_p8, %p604_p5 }
  0x32   :  { %614 = shalt.err (!%p611_p9)
}
  0x33   :  { %s694_s0 = smov 128   ;;  %s695_s27 = smov 8  }
  0x34   :  { %49 = dma.hbm_to_vmem [thread:$0]  %s836_s2, 512, %s44_s25, [#allocation8], %s694_s0, %s694_s0, %s695_s27  }
  0x35   :  { %s696_s14 = smov [#allocation10]   ;;  %s615_s18 = scalar_lea.hbm %s837_s3, 512 }
  0x36   :  { %s55_s15 = sshll.u32 %s696_s14, 4  ;;  %p616_p10 = scmp.ne.s32.totalorder %s837_s3, %s615_s18  ;;  %s56_s15 = int_to_ptr.vmem [resolvable:$true] %s55_s15 }
  0x37   :  { %p619_p11 = scmp.lt.u32.totalorder %s615_s18, %s837_s3 }
  0x39   :  { %p621_p12 = pnand %p619_p11, %p616_p10 }
  0x3b   :  { %624 = shalt.err (!%p621_p12)
}
  0x3c   :  { %s625_s1 = scalar_lea.vmem %s56_s15, 512  ;;  %p630_p0 = scmp.lt.s32.totalorder %s56_s15, %s56_s15 }
  0x3d   :  { %p626_p13 = scmp.ne.s32.totalorder %s56_s15, %s625_s1  ;;  %p631_p1 = scmp.lt.s32.totalorder %s625_s1, %s625_s1 }
  0x3f   :  { %p632_p2 = por %p631_p1, %p630_p0 }
  0x41   :  { %p633_p3 = pnand %p632_p2, %p626_p13 }
  0x43   :  { %636 = shalt.err (!%p633_p3)
}
  0x44   :  { %61 = dma.hbm_to_vmem [thread:$0]  %s837_s3, 512, %s56_s15, [#allocation11], %s694_s0, %s694_s0, %s695_s27  }
  0x45   :  { %681 = dma.done.wait [#allocation5], 64  }
  0x46   :  { %682 = vsyncadd [#allocation5], 4294967232 }
  0x47   :  { %683 = dma.done.wait [#allocation8], 576  }
  0x48   :  { %684 = vsyncadd [#allocation8], 4294966720 }
  0x49   :  { %685 = dma.done.wait [#allocation11], 512  }
  0x4a   :  { %686 = vsyncadd [#allocation11], 4294966784  ;;  %v697_v0 = vmov 0.0|0.0   ;;  %vm698_vm0 = vmmov 0   ;;  %v699_v1 = vmov 0.0   ;;  %v87_v2 = vld [vmem:[#allocation9] sm:$0xff] }
  0x4b   :  { %514 = vmatprep.subr.bf16.mxu0 %v697_v0  ;;  %520 = vmatprep.subr.bf16.mxu1 %v697_v0  ;;  %v88_v3 = vld [vmem:[#allocation9 + $0x8] sm:$0xff]  ;;  %v91_v4 = vld [vmem:[#allocation10] sm:$0xff]  ;;  %v89_v7 = vld [vmem:[#allocation9 + $0x10] sm:$0xff]  ;;  %vm96_vm1 = vcmask 261120   ;;  %vm82_vm2 = vcmask 519168   ;;  %s700_s25 = smov [#allocation12]  }
  0x4c   :  { %478 = vmatprep.mubr.msk.f32.mxu0 %vm698_vm0, %v699_v1  ;;  %489 = vmatprep.mubr.msk.f32.mxu1 %vm698_vm0, %v699_v1  ;;  %v515_v5 = vpack.c.bf16 %v88_v3, %v87_v2  ;;  %v92_v6 = vld [vmem:[#allocation10 + $0x8] sm:$0xff]  ;;  %v90_v8 = vld [vmem:[#allocation9 + $0x18] sm:$0xff]  ;;  %v93_v10 = vld [vmem:[#allocation10 + $0x10] sm:$0xff]  ;;  %83 = vst.msk [vmem:[#allocation2] sm:$0xf] %vm82_vm2, %v699_v1  ;;  %s419_s26 = sshll.u32 %s700_s25, 4  ;;  %s420_s26 = int_to_ptr.vmem [resolvable:$true] %s419_s26 }
  0x4d   :  { %v521_v9 = vpack.c.bf16 %v92_v6, %v91_v4  ;;  %v94_v11 = vld [vmem:[#allocation10 + $0x18] sm:$0xff]  ;;  %v518_v12 = vpack.c.bf16 %v90_v8, %v89_v7  ;;  %84 = vst.msk [vmem:[#allocation3] sm:$0xf] %vm82_vm2, %v699_v1  ;;  %v448_v29 = vld [vmem:[%s838_s4] ss:$0 sm:$0xff]  ;;  %s637_s28 = scalar_lea.vmem %s420_s26, 64  ;;  %p642_p5 = scmp.lt.s32.totalorder %s420_s26, %s420_s26 }
  0x4e   :  { %516 = vmatpush3.bf16.msra.mxu0 %v515_v5  ;;  %v524_v13 = vpack.c.bf16 %v94_v11, %v93_v10  ;;  %v85_v14 = vld [vmem:[#allocation4] sm:$0xf]  ;;  %v86_v15 = vld [vmem:[#allocation7] sm:$0xf]  ;;  %p638_p4 = scmp.ne.s32.totalorder %s420_s26, %s637_s28  ;;  %p643_p6 = scmp.lt.s32.totalorder %s637_s28, %s637_s28 }
  0x4f   :  { %522 = vmatpush3.bf16.msra.mxu1 %v521_v9  ;;  %517 = vmatprep.subr.bf16.mxu0 %v697_v0 }
  0x50   :  { %523 = vmatprep.subr.bf16.mxu1 %v697_v0  ;;  %p644_p7 = por %p643_p6, %p642_p5 }
  0x52   :  { %519 = vmatpush3.bf16.msra.mxu0 %v518_v12  ;;  %p645_p8 = pnand %p644_p7, %p638_p4 }
  0x53   :  { %525 = vmatpush3.bf16.msra.mxu1 %v524_v13  ;;  %526 = vmatprep.subr.bf16.mxu0 %v697_v0  ;;  %v95_v17 = vld [vmem:[#allocation2] sm:$0xf] }
  0x54   :  { %532 = vmatprep.subr.bf16.mxu1 %v697_v0  ;;  %v247_v24 = vld [vmem:[#allocation3] sm:$0xf] }
  0x55   :  { %479 = vmatmul.mubr.msk.f32.vlgmr.msra.gmra.mrb[0].mxu0 %vm96_vm1, %v85_v14 }
  0x56   :  { %490 = vmatmul.mubr.msk.f32.vlgmr.msra.gmra.mrb[0].mxu1 %vm96_vm1, %v86_v15  ;;  %528 = vmatpush3.bf16.msra.mxu0 %v521_v9 }
  0x57   :  { %534 = vmatpush3.bf16.msra.mxu1 %v515_v5  ;;  %529 = vmatprep.subr.bf16.mxu0 %v697_v0 }
  0x58   :  { %535 = vmatprep.subr.bf16.mxu1 %v697_v0  ;;  %500 = vmatprep.mubr.msk.f32.mxu0 %vm698_vm0, %v699_v1 }
  0x59   :  { %511 = vmatprep.mubr.msk.f32.mxu1 %vm698_vm0, %v699_v1 }
  0x5a   :  { %531 = vmatpush3.bf16.msra.mxu0 %v524_v13 }
  0x5b   :  { %537 = vmatpush3.bf16.msra.mxu1 %v518_v12 }
  0x5d   :  { %501 = vmatmul.mubr.msk.f32.vlgmr.msra.gmra.mrb[2].mxu0 %vm96_vm1, %v85_v14 }
  0x5e   :  { %512 = vmatmul.mubr.msk.f32.vlgmr.msra.gmra.mrb[2].mxu1 %vm96_vm1, %v86_v15 }
 0x128   :  { %v166_v16 = vpop.f32.mrb[0].mxu0 }
 0x129   :  { %v239_v18 = vpop.f32.mrb[0].mxu1  ;;  %v480_v19 = vpop.f32.mrb[1].mxu0 }
 0x12a   :  { %v243_v20 = vsub.f32 %v166_v16, %v239_v18  ;;  %v491_v21 = vpop.f32.mrb[1].mxu1 }
 0x12c   :  { %v244_v22 = vadd.f32 %v243_v20, %v95_v17 }
 0x12e   :  { %246 = vst.msk [vmem:[#allocation2] sm:$0xf] %vm82_vm2, %v244_v22 }
 0x130   :  { %v314_v23 = vpop.f32.mrb[2].mxu0 }
 0x131   :  { %v384_v25 = vpop.f32.mrb[2].mxu1  ;;  %v502_v26 = vpop.f32.mrb[3].mxu0 }
 0x132   :  { %v385_v27 = vadd.f32 %v384_v25, %v314_v23  ;;  %v513_v28 = vpop.f32.mrb[3].mxu1 }
 0x134   :  { %v388_v30 = vadd.f32 %v385_v27, %v247_v24 }
 0x135   :  { %v393_v31 = vld [vmem:[#allocation2] sm:$0xf] }
 0x136   :  { %389 = vst.msk [vmem:[#allocation3] sm:$0xf] %vm82_vm2, %v388_v30  ;;  %v401_v32 = vadd.f32 %v448_v29, %v393_v31 }
 0x138   :  { %402 = vst.msk [vmem:[#allocation12] sm:$0xf] %vm82_vm2, %v401_v32 }
 0x139   :  { %648 = shalt.err (!%p645_p8)
}
 0x13a   :  { %s649_s4 = scalar_lea.hbm %s840_s6, 64 }
 0x13b   :  { %p650_p9 = scmp.ne.s32.totalorder %s840_s6, %s649_s4  ;;  %p653_p10 = scmp.lt.u32.totalorder %s649_s4, %s840_s6 }
 0x13d   :  { %p655_p11 = pnand %p653_p10, %p650_p9 }
 0x13f   :  { %658 = shalt.err (!%p655_p11)
}
 0x140   :  { %422 = dma.vmem_to_hbm [thread:$0]  %s420_s26, 64, %s840_s6, [#allocation6]   ;;  %v449_v33 = vld [vmem:[%s839_s5] ss:$0 sm:$0xff]  ;;  %v403_v34 = vld [vmem:[#allocation3] sm:$0xf] }
 0x141   :  { %s701_s14 = smov [#allocation13]   ;;  %v411_v35 = vadd.f32 %v449_v33, %v403_v34 }
 0x142   :  { %s429_s15 = sshll.u32 %s701_s14, 4  ;;  %s430_s15 = int_to_ptr.vmem [resolvable:$true] %s429_s15 }
 0x143   :  { %412 = vst.msk [vmem:[#allocation13] sm:$0xf] %vm82_vm2, %v411_v35  ;;  %s659_s16 = scalar_lea.vmem %s430_s15, 64  ;;  %p664_p13 = scmp.lt.s32.totalorder %s430_s15, %s430_s15 }
 0x144   :  { %p660_p12 = scmp.ne.s32.totalorder %s430_s15, %s659_s16  ;;  %p665_p0 = scmp.lt.s32.totalorder %s659_s16, %s659_s16 }
 0x146   :  { %p666_p1 = por %p665_p0, %p664_p13 }
 0x148   :  { %p667_p2 = pnand %p666_p1, %p660_p12 }
 0x14a   :  { %670 = shalt.err (!%p667_p2)
}
 0x14b   :  { %s671_s18 = scalar_lea.hbm %s841_s7, 64 }
 0x14c   :  { %p672_p3 = scmp.ne.s32.totalorder %s841_s7, %s671_s18  ;;  %p675_p4 = scmp.lt.u32.totalorder %s671_s18, %s841_s7 }
 0x14e   :  { %p677_p5 = pnand %p675_p4, %p672_p3 }
 0x150   :  { %680 = shalt.err (!%p677_p5)
}
 0x151   :  { %432 = dma.vmem_to_hbm [thread:$0]  %s430_s15, 64, %s841_s7, [#allocation14]  }
 0x152   :  { %687 = dma.done.wait [#allocation6], 64  }
 0x153   :  { %688 = vsyncadd [#allocation6], 4294967232 }
 0x154   :  { %689 = dma.done.wait [#allocation14], 64  }
 0x155   :  { %690 = vsyncadd [#allocation14], 4294967232 }
 0x156   :  { %439 = vsyncpa [#allocation5], 1 }
 0x157   :  { %440 = vsyncpa [#allocation8], 1 }
 0x158   :  { %441 = vsyncpa [#allocation11], 1 }
 0x159   :  { %442 = vsyncpa [#allocation6], 1 }
 0x15a   :  { %443 = vsyncpa [#allocation14], 1 }

</bundles_post_ra>
